<compile_context>
chip_gen: v6e
topology: v6e:2x2x1
jax: 0.10.0
libtpu: 0.0.40
codegen_flags: <defaults>
</compile_context>

<pallas_src>
import functools

import jax
import jax.numpy as jnp
from jax import lax
from jax.experimental import pallas as pl
from jax.experimental.pallas import tpu as pltpu

_LANES = 128
_SUB = 8          # sublanes per f32 vreg; all row tiles are multiples of this


def _round_up(x, m):
    return (x + m - 1) // m * m


# ----------------------------------------------------------------------------
# shared elementwise math
# ----------------------------------------------------------------------------
def _focal_from_logits(x, z, *, alpha, gamma):
    """x: f32 logits, z: f32 one-hot mask (same shape) -> elementwise focal loss."""
    # s = (1 - 2z) * x   (exact: multiply by +/-1)
    s = x * (1.0 - 2.0 * z)
    e = jnp.exp(-jnp.abs(s))                       # one EUP exp per element
    # stable BCE-with-logits(x, z) == softplus(s) = max(s,0) + log1p(exp(-|s|))
    bce = jnp.maximum(s, 0.0) + jnp.log1p(e)
    # 1 - pt == sigmoid(s); exact f32 divide (cheap, kernel is memory-bound)
    den = 1.0 + e
    num = jnp.where(s >= 0.0, 1.0, e)
    omp = num / den
    # focal weight: specialise integer gamma -> pure multiplies (no exp/log)
    g = float(gamma)
    if g == 2.0:
        focal_w = omp * omp
    elif g == 1.0:
        focal_w = omp
    elif g == 0.0:
        focal_w = jnp.ones_like(omp)
    elif g.is_integer() and 0.0 < g <= 8.0:
        focal_w = omp
        for _ in range(int(g) - 1):
            focal_w = focal_w * omp
    else:
        focal_w = omp ** g                         # non-integer gamma: EUP pow
    alpha_w = (1.0 - alpha) + z * (2.0 * alpha - 1.0)
    return alpha_w * focal_w * bce


def _z_from_hot(hot, shape):
    """One-hot mask for the lane-dense layout.

    hot[r, g] is the lane index (within the 128-wide row r) of the positive
    class of the g-th anchor packed into that row.  Cheap VPU compares only.
    """
    lane = lax.broadcasted_iota(jnp.int32, shape, 1)
    z = jnp.zeros(shape, jnp.float32)
    for g in range(hot.shape[-1]):
        z = z + (lane == hot[:, g:g + 1]).astype(jnp.float32)
    return z


def _row_mask(shape, tile_rows, valid_rows):
    """1.0 for real rows, 0.0 for rows added by padding."""
    row = pl.program_id(0) * tile_rows + lax.broadcasted_iota(jnp.int32, shape, 0)
    return (row < valid_rows).astype(jnp.float32)


# ----------------------------------------------------------------------------
# lane-dense kernels (128 % C == 0)
# ----------------------------------------------------------------------------
def _dense_none_kernel(hot_ref, pred_ref, out_ref, *, alpha, gamma):
    x = pred_ref[...].astype(jnp.float32)
    z = _z_from_hot(hot_ref[...], x.shape)
    out_ref[...] = _focal_from_logits(x, z, alpha=alpha, gamma=gamma)


def _dense_partial_kernel(hot_ref, pred_ref, out_ref, *, alpha, gamma,
                          tile_rows, valid_rows):
    x = pred_ref[...].astype(jnp.float32)
    z = _z_from_hot(hot_ref[...], x.shape)
    loss = _focal_from_logits(x, z, alpha=alpha, gamma=gamma)
    if valid_rows is not None:                       # mask padded rows
        loss = loss * _row_mask(loss.shape, tile_rows, valid_rows)
    r, c = loss.shape
    # per-lane partial sums: pure VPU adds, no cross-lane reduce in-kernel
    out_ref[...] = jnp.sum(loss.reshape(r // _SUB, _SUB, c), axis=0)


# ----------------------------------------------------------------------------
# general-C fallback kernels ([tm, C] row blocks)
# ----------------------------------------------------------------------------
def _rows_none_kernel(tgt_ref, pred_ref, out_ref, *, alpha, gamma):
    x = pred_ref[...].astype(jnp.float32)
    cls = lax.broadcasted_iota(jnp.int32, x.shape, 1)
    z = (cls == tgt_ref[...]).astype(jnp.float32)
    out_ref[...] = _focal_from_logits(x, z, alpha=alpha, gamma=gamma)


def _rows_partial_kernel(tgt_ref, pred_ref, out_ref, *, alpha, gamma,
                         tile_rows, valid_rows):
    x = pred_ref[...].astype(jnp.float32)
    cls = lax.broadcasted_iota(jnp.int32, x.shape, 1)
    z = (cls == tgt_ref[...]).astype(jnp.float32)
    loss = _focal_from_logits(x, z, alpha=alpha, gamma=gamma)
    if valid_rows is not None:
        loss = loss * _row_mask(loss.shape, tile_rows, valid_rows)
    r, c = loss.shape
    out_ref[...] = jnp.sum(loss.reshape(r // _SUB, _SUB, c), axis=0)


# ----------------------------------------------------------------------------
# wrapper
# ----------------------------------------------------------------------------
def focal_loss(pred, target, *, alpha=0.25, gamma=2.0, reduction="mean",
               max_rows_per_block=2048):
    """Pallas focal loss.  pred: [B, N, C] float, target: [B, N] int."""
    if reduction not in ("mean", "sum", "none"):
        raise ValueError(f"unknown reduction: {reduction}")
    B, N, C = pred.shape
    M = B * N
    total = M * C
    alpha = float(alpha)
    gamma = float(gamma)
    max_rows_per_block = max(_SUB, (int(max_rows_per_block) // _SUB) * _SUB)

    params = pltpu.CompilerParams(dimension_semantics=("parallel",))
    lane_dense = (C >= 8) and (_LANES % C == 0) and (M % (_LANES // C) == 0)

    if lane_dense:
        # --- lane-dense layout: view logits as [rows, 128] (free reshape) ---
        G = _LANES // C                       # anchors packed per 128-lane row
        rows = M // G
        pred2 = pred.reshape(rows, _LANES)    # caller dtype preserved (bf16 OK)
        hot = (target.reshape(rows, G).astype(jnp.int32)
               + (jnp.arange(G, dtype=jnp.int32) * C)[None, :])

        tl = min(max_rows_per_block, _round_up(rows, _SUB))
        rows_p = _round_up(rows, tl)
        padded = rows_p != rows
        if padded:
            pred2 = jnp.pad(pred2, ((0, rows_p - rows), (0, 0)))
            hot = jnp.pad(hot, ((0, rows_p - rows), (0, 0)))
        grid = (rows_p // tl,)
        in_specs = [
            pl.BlockSpec((tl, G), lambda i: (i, 0)),
            pl.BlockSpec((tl, _LANES), lambda i: (i, 0)),
        ]

        if reduction == "none":
            out = pl.pallas_call(
                functools.partial(_dense_none_kernel, alpha=alpha, gamma=gamma),
                out_shape=jax.ShapeDtypeStruct((rows_p, _LANES), jnp.float32),
                grid_spec=pltpu.PrefetchScalarGridSpec(
                    num_scalar_prefetch=0, grid=grid, in_specs=in_specs,
                    out_specs=pl.BlockSpec((tl, _LANES), lambda i: (i, 0))),
                compiler_params=params,
            )(hot, pred2)
            if padded:
                out = out[:rows]
            return out.reshape(B, N, C)

        # mean / sum: per-block per-lane partial sums, final reduce outside.
        partials = pl.pallas_call(
            functools.partial(_dense_partial_kernel, alpha=alpha, gamma=gamma,
                              tile_rows=tl,
                              valid_rows=(rows if padded else None)),
            out_shape=jax.ShapeDtypeStruct((grid[0] * _SUB, _LANES), jnp.float32),
            grid_spec=pltpu.PrefetchScalarGridSpec(
                num_scalar_prefetch=0, grid=grid, in_specs=in_specs,
                out_specs=pl.BlockSpec((_SUB, _LANES), lambda i: (i, 0))),
            compiler_params=params,
        )(hot, pred2)
        loss_sum = jnp.sum(partials)
        return loss_sum / total if reduction == "mean" else loss_sum

    # --- general-C fallback: [tm, C] row blocks ---
    pred2 = pred.reshape(M, C)
    tgt2 = target.reshape(M, 1).astype(jnp.int32)
    # keep a block of logits around ~1 MiB, multiple of 8 rows
    max_tm = max(_SUB, min(8192, (1 << 20) // max(4 * C, 1)) // _SUB * _SUB)
    tm = min(max_tm, _round_up(M, _SUB))
    M_p = _round_up(M, tm)
    padded = M_p != M
    if padded:
        pred2 = jnp.pad(pred2, ((0, M_p - M), (0, 0)))
        tgt2 = jnp.pad(tgt2, ((0, M_p - M), (0, 0)), constant_values=-1)
    grid = (M_p // tm,)
    in_specs = [
        pl.BlockSpec((tm, 1), lambda i: (i, 0)),
        pl.BlockSpec((tm, C), lambda i: (i, 0)),
    ]

    if reduction == "none":
        out = pl.pallas_call(
            functools.partial(_rows_none_kernel, alpha=alpha, gamma=gamma),
            out_shape=jax.ShapeDtypeStruct((M_p, C), jnp.float32),
            grid_spec=pltpu.PrefetchScalarGridSpec(
                num_scalar_prefetch=0, grid=grid, in_specs=in_specs,
                out_specs=pl.BlockSpec((tm, C), lambda i: (i, 0))),
            compiler_params=params,
        )(tgt2, pred2)
        if padded:
            out = out[:M]
        return out.reshape(B, N, C)

    partials = pl.pallas_call(
        functools.partial(_rows_partial_kernel, alpha=alpha, gamma=gamma,
                          tile_rows=tm, valid_rows=(M if padded else None)),
        out_shape=jax.ShapeDtypeStruct((grid[0] * _SUB, C), jnp.float32),
        grid_spec=pltpu.PrefetchScalarGridSpec(
            num_scalar_prefetch=0, grid=grid, in_specs=in_specs,
            out_specs=pl.BlockSpec((_SUB, C), lambda i: (i, 0))),
        compiler_params=params,
    )(tgt2, pred2)
    loss_sum = jnp.sum(partials)
    return loss_sum / total if reduction == "mean" else loss_sum


# ----------------------------------------------------------------------------
# pure-JAX reference mirroring the PyTorch module
# ----------------------------------------------------------------------------
def focal_loss_ref(pred, target, alpha=0.25, gamma=2.0, reduction="mean"):
    C = pred.shape[-1]
    z = jax.nn.one_hot(target.astype(jnp.int32), C, dtype=jnp.float32)
    x = pred.astype(jnp.float32)
    p = jax.nn.sigmoid(x)
    pt = z * p + (1 - z) * (1 - p)
    focal_w = (1 - pt) ** gamma
    alpha_w = z * alpha + (1 - z) * (1 - alpha)
    bce = jnp.maximum(x, 0.0) - x * z + jnp.log1p(jnp.exp(-jnp.abs(x)))
    loss = alpha_w * focal_w * bce
    if reduction == "mean":
        return loss.mean()
    if reduction == "sum":
        return loss.sum()
    return loss


if __name__ == "__main__":
    key = jax.random.PRNGKey(0)
    kp, kt = jax.random.split(key)

    # Lane-dense path: B=2, N=64 anchors, C=16 classes.
    B, N, C = 2, 64, 16
    pred = jax.random.normal(kp, (B, N, C), dtype=jnp.float32)
    target = jax.random.randint(kt, (B, N), 0, C, dtype=jnp.int32)

    for red in ("mean", "sum", "none"):
        out = jax.block_until_ready(focal_loss(pred, target, reduction=red))
        ref = focal_loss_ref(pred, target, reduction=red)
        assert jnp.allclose(out, ref, rtol=1e-5, atol=1e-6), (red, out, ref)

    # Multi-block grid on the lane-dense path (16 rows, 8-row tiles -> grid=(2,)).
    out_mb = jax.block_until_ready(
        focal_loss(pred, target, reduction="mean", max_rows_per_block=8))
    assert jnp.allclose(out_mb, focal_loss_ref(pred, target, reduction="mean"),
                        rtol=1e-5, atol=1e-6)

    # Lane-dense path with row padding + in-kernel masking (rows=3 -> padded to 8).
    kp1, kt1 = jax.random.split(jax.random.PRNGKey(2))
    pred1 = jax.random.normal(kp1, (1, 24, 16), dtype=jnp.float32)
    target1 = jax.random.randint(kt1, (1, 24), 0, 16, dtype=jnp.int32)
    for red in ("mean", "none"):
        out = jax.block_until_ready(focal_loss(pred1, target1, reduction=red))
        ref = focal_loss_ref(pred1, target1, reduction=red)
        assert jnp.allclose(out, ref, rtol=1e-5, atol=1e-6), (red,)

    # bf16 logits through the lane-dense path (cast to f32 happens in-kernel).
    pred_bf = pred.astype(jnp.bfloat16)
    out_bf = jax.block_until_ready(focal_loss(pred_bf, target, reduction="mean"))
    ref_bf = focal_loss_ref(pred_bf, target, reduction="mean")
    assert jnp.allclose(out_bf, ref_bf, rtol=1e-4, atol=1e-5)

    # General-C fallback (C=12 does not divide 128) with ragged rows (M=60 -> 64).
    B2, N2, C2 = 2, 30, 12
    kp2, kt2 = jax.random.split(jax.random.PRNGKey(1))
    pred2 = jax.random.normal(kp2, (B2, N2, C2), dtype=jnp.float32)
    target2 = jax.random.randint(kt2, (B2, N2), 0, C2, dtype=jnp.int32)
    for red in ("mean", "sum", "none"):
        out = jax.block_until_ready(focal_loss(pred2, target2, reduction=red))
        ref = focal_loss_ref(pred2, target2, reduction=red)
        assert jnp.allclose(out, ref, rtol=1e-5, atol=1e-6), (red,)

    print("KERNEL_OK")
</pallas_src>

<mosaic_0001>
module attributes {stable_mosaic.version = 11 : i64} {
  func.func @_dense_partial_kernel(%arg0: i32, %arg1: memref<16x8xi32, #tpu.memory_space<vmem>>, %arg2: memref<16x128xf32, #tpu.memory_space<vmem>>, %arg3: memref<8x128xf32, #tpu.memory_space<vmem>>) attributes {dimension_semantics = [#tpu.dimension_semantics<parallel>], iteration_bounds = array<i64: 1>, scalar_prefetch = 0 : i64, scratch_operands = 0 : i64, tpu.core_type = #tpu.core_type<tc>, window_params = [{transform_indices = @transform_0, window_bounds = array<i64: 16, 8>}, {transform_indices = @transform_1, window_bounds = array<i64: 16, 128>}, {transform_indices = @transform_2, window_bounds = array<i64: 8, 128>}]} {
    %c0 = arith.constant 0 : index
    %c0_0 = arith.constant 0 : index
    %0 = vector.load %arg2[%c0, %c0_0] : memref<16x128xf32, #tpu.memory_space<vmem>>, vector<16x128xf32>
    %c0_1 = arith.constant 0 : index
    %c0_2 = arith.constant 0 : index
    %1 = vector.load %arg1[%c0_1, %c0_2] : memref<16x8xi32, #tpu.memory_space<vmem>>, vector<16x8xi32>
    %2 = tpu.iota {dimensions = array<i32: 1>} : vector<16x128xi32>
    %cst = arith.constant 0.000000e+00 : f32
    %3 = vector.broadcast %cst : f32 to vector<16x128xf32>
    %4 = vector.extract_strided_slice %1 {offsets = [0, 0], sizes = [16, 1], strides = [1, 1]} : vector<16x8xi32> to vector<16x1xi32>
    %5 = vector.broadcast %4 : vector<16x1xi32> to vector<16x128xi32>
    %6 = arith.cmpi eq, %2, %5 : vector<16x128xi32>
    %7 = arith.extui %6 : vector<16x128xi1> to vector<16x128xi32>
    %8 = arith.sitofp %7 : vector<16x128xi32> to vector<16x128xf32>
    %9 = arith.addf %3, %8 : vector<16x128xf32>
    %10 = vector.extract_strided_slice %1 {offsets = [0, 1], sizes = [16, 1], strides = [1, 1]} : vector<16x8xi32> to vector<16x1xi32>
    %11 = vector.broadcast %10 : vector<16x1xi32> to vector<16x128xi32>
    %12 = arith.cmpi eq, %2, %11 : vector<16x128xi32>
    %13 = arith.extui %12 : vector<16x128xi1> to vector<16x128xi32>
    %14 = arith.sitofp %13 : vector<16x128xi32> to vector<16x128xf32>
    %15 = arith.addf %9, %14 : vector<16x128xf32>
    %16 = vector.extract_strided_slice %1 {offsets = [0, 2], sizes = [16, 1], strides = [1, 1]} : vector<16x8xi32> to vector<16x1xi32>
    %17 = vector.broadcast %16 : vector<16x1xi32> to vector<16x128xi32>
    %18 = arith.cmpi eq, %2, %17 : vector<16x128xi32>
    %19 = arith.extui %18 : vector<16x128xi1> to vector<16x128xi32>
    %20 = arith.sitofp %19 : vector<16x128xi32> to vector<16x128xf32>
    %21 = arith.addf %15, %20 : vector<16x128xf32>
    %22 = vector.extract_strided_slice %1 {offsets = [0, 3], sizes = [16, 1], strides = [1, 1]} : vector<16x8xi32> to vector<16x1xi32>
    %23 = vector.broadcast %22 : vector<16x1xi32> to vector<16x128xi32>
    %24 = arith.cmpi eq, %2, %23 : vector<16x128xi32>
    %25 = arith.extui %24 : vector<16x128xi1> to vector<16x128xi32>
    %26 = arith.sitofp %25 : vector<16x128xi32> to vector<16x128xf32>
    %27 = arith.addf %21, %26 : vector<16x128xf32>
    %28 = vector.extract_strided_slice %1 {offsets = [0, 4], sizes = [16, 1], strides = [1, 1]} : vector<16x8xi32> to vector<16x1xi32>
    %29 = vector.broadcast %28 : vector<16x1xi32> to vector<16x128xi32>
    %30 = arith.cmpi eq, %2, %29 : vector<16x128xi32>
    %31 = arith.extui %30 : vector<16x128xi1> to vector<16x128xi32>
    %32 = arith.sitofp %31 : vector<16x128xi32> to vector<16x128xf32>
    %33 = arith.addf %27, %32 : vector<16x128xf32>
    %34 = vector.extract_strided_slice %1 {offsets = [0, 5], sizes = [16, 1], strides = [1, 1]} : vector<16x8xi32> to vector<16x1xi32>
    %35 = vector.broadcast %34 : vector<16x1xi32> to vector<16x128xi32>
    %36 = arith.cmpi eq, %2, %35 : vector<16x128xi32>
    %37 = arith.extui %36 : vector<16x128xi1> to vector<16x128xi32>
    %38 = arith.sitofp %37 : vector<16x128xi32> to vector<16x128xf32>
    %39 = arith.addf %33, %38 : vector<16x128xf32>
    %40 = vector.extract_strided_slice %1 {offsets = [0, 6], sizes = [16, 1], strides = [1, 1]} : vector<16x8xi32> to vector<16x1xi32>
    %41 = vector.broadcast %40 : vector<16x1xi32> to vector<16x128xi32>
    %42 = arith.cmpi eq, %2, %41 : vector<16x128xi32>
    %43 = arith.extui %42 : vector<16x128xi1> to vector<16x128xi32>
    %44 = arith.sitofp %43 : vector<16x128xi32> to vector<16x128xf32>
    %45 = arith.addf %39, %44 : vector<16x128xf32>
    %46 = vector.extract_strided_slice %1 {offsets = [0, 7], sizes = [16, 1], strides = [1, 1]} : vector<16x8xi32> to vector<16x1xi32>
    %47 = vector.broadcast %46 : vector<16x1xi32> to vector<16x128xi32>
    %48 = arith.cmpi eq, %2, %47 : vector<16x128xi32>
    %49 = arith.extui %48 : vector<16x128xi1> to vector<16x128xi32>
    %50 = arith.sitofp %49 : vector<16x128xi32> to vector<16x128xf32>
    %51 = arith.addf %45, %50 : vector<16x128xf32>
    %cst_3 = arith.constant 2.000000e+00 : f32
    %52 = vector.broadcast %cst_3 : f32 to vector<16x128xf32>
    %53 = arith.mulf %52, %51 : vector<16x128xf32>
    %cst_4 = arith.constant 1.000000e+00 : f32
    %54 = vector.broadcast %cst_4 : f32 to vector<16x128xf32>
    %55 = arith.subf %54, %53 : vector<16x128xf32>
    %56 = arith.mulf %0, %55 : vector<16x128xf32>
    %57 = math.absf %56 : vector<16x128xf32>
    %cst_5 = arith.constant 0.000000e+00 : f32
    %58 = vector.broadcast %cst_5 : f32 to vector<16x128xf32>
    %59 = arith.subf %58, %57 : vector<16x128xf32>
    %60 = math.exp %59 : vector<16x128xf32>
    %cst_6 = arith.constant 0.000000e+00 : f32
    %61 = vector.broadcast %cst_6 : f32 to vector<16x128xf32>
    %62 = arith.maximumf %56, %61 : vector<16x128xf32>
    %63 = math.log1p %60 : vector<16x128xf32>
    %64 = arith.addf %62, %63 : vector<16x128xf32>
    %cst_7 = arith.constant 1.000000e+00 : f32
    %65 = vector.broadcast %cst_7 : f32 to vector<16x128xf32>
    %66 = arith.addf %65, %60 : vector<16x128xf32>
    %cst_8 = arith.constant 0.000000e+00 : f32
    %67 = vector.broadcast %cst_8 : f32 to vector<16x128xf32>
    %68 = arith.cmpf oge, %56, %67 : vector<16x128xf32>
    %cst_9 = arith.constant 1.000000e+00 : f32
    %69 = vector.broadcast %cst_9 : f32 to vector<16x128xf32>
    %70 = arith.select %68, %69, %60 : vector<16x128xi1>, vector<16x128xf32>
    %71 = arith.divf %70, %66 : vector<16x128xf32>
    %72 = arith.mulf %71, %71 : vector<16x128xf32>
    %cst_10 = arith.constant -5.000000e-01 : f32
    %73 = vector.broadcast %cst_10 : f32 to vector<16x128xf32>
    %74 = arith.mulf %51, %73 : vector<16x128xf32>
    %cst_11 = arith.constant 7.500000e-01 : f32
    %75 = vector.broadcast %cst_11 : f32 to vector<16x128xf32>
    %76 = arith.addf %75, %74 : vector<16x128xf32>
    %77 = arith.mulf %76, %72 : vector<16x128xf32>
    %78 = arith.mulf %77, %64 : vector<16x128xf32>
    %79 = vector.shape_cast %78 : vector<16x128xf32> to vector<2x8x128xf32>
    %cst_12 = arith.constant dense<0.000000e+00> : vector<8x128xf32>
    %80 = vector.multi_reduction <add>, %79, %cst_12 [0] : vector<2x8x128xf32> to vector<8x128xf32>
    %c0_13 = arith.constant 0 : index
    %c0_14 = arith.constant 0 : index
    %81 = vector.load %arg3[%c0_13, %c0_14] : memref<8x128xf32, #tpu.memory_space<vmem>>, vector<8x128xf32>
    tpu.vector_store %arg3[%c0_13, %c0_14], %80 {strides = array<i32>} : memref<8x128xf32, #tpu.memory_space<vmem>>, vector<8x128xf32>,
    return
  }
  func.func @transform_0(%arg0: i32) -> (i32, i32) {
    %c0_i32 = arith.constant 0 : i32
    %c0_i32_0 = arith.constant 0 : i32
    return %arg0, %c0_i32 : i32, i32
  }
  func.func @transform_1(%arg0: i32) -> (i32, i32) {
    %c0_i32 = arith.constant 0 : i32
    %c0_i32_0 = arith.constant 0 : i32
    return %arg0, %c0_i32 : i32, i32
  }
  func.func @transform_2(%arg0: i32) -> (i32, i32) {
    %c0_i32 = arith.constant 0 : i32
    %c0_i32_0 = arith.constant 0 : i32
    return %arg0, %c0_i32 : i32, i32
  }
}

</mosaic_0001>

<bundles_post_ra>
// kernel: tpu_custom_call.1
= control target key start
LH: loop header
LB: loop body
LE: loop exit
PB: predicated region body
PF: predicated region fallthrough
CT: control target
= control target key end

     0   :  { %v275_v1 = vmov 1   ;;  %v276_v2 = vmov 0   ;;  %s315_s0 = inlined_call_operand.vmem [shape: s32[16,8], index: 0, kind: input, shape index: {}]   ;;  %s316_s1 = inlined_call_operand.vmem [shape: f32[16,128], index: 1, kind: input, shape index: {}]   ;;  %s317_s2 = inlined_call_operand.hbm [shape: f32[8,128], index: 2, kind: output, shape index: {}]  }
   0x1   :  { %v14_v0 = vld [vmem:[%s315_s0] sm:$0xff]  ;;  %229 = vset.pattern.permute.xlu1 %v275_v1  ;;  %228 = vset.pattern.permute.xlu0 %v276_v2 }
   0x2   :  { %7 = vsyncpa [#allocation3], 0  ;;  %33 = vperm.xlu1 %229, %v14_v0   ;;  %19 = vperm.xlu0 %228, %v14_v0   ;;  %v15_v3 = vld [vmem:[%s315_s0 + $0x8] sm:$0xff]  ;;  %v277_v4 = vmov 2   ;;  %v278_v5 = vmov 3   ;;  %v279_v6 = vmov 4   ;;  %v16_v15 = vlaneseq }
   0x3   :  { %v280_v7 = vmov 5   ;;  %v281_v8 = vmov 6   ;;  %v282_v9 = vmov 7   ;;  %v283_v21 = vmov 0.0   ;;  %v12_v58 = vld [vmem:[%s316_s1] sm:$0xff] }
   0x4   :  { %v17_v17 = vand.u32 127, %v16_v15 }
   0x6   :  { %36 = vperm.xlu1 %229, %v15_v3   ;;  %22 = vperm.xlu0 %228, %v15_v3  }
   0xa   :  { %231 = vset.pattern.permute.xlu1 %v277_v4  ;;  %230 = vset.pattern.permute.xlu0 %v277_v4 }
   0xb   :  { %50 = vperm.xlu1 %231, %v15_v3   ;;  %47 = vperm.xlu0 %230, %v14_v0  }
   0xf   :  { %232 = vset.pattern.permute.xlu1 %v278_v5  ;;  %233 = vset.pattern.permute.xlu0 %v278_v5 }
  0x10   :  { %61 = vperm.xlu1 %232, %v14_v0   ;;  %64 = vperm.xlu0 %233, %v15_v3  }
  0x14   :  { %234 = vset.pattern.permute.xlu1 %v279_v6  ;;  %235 = vset.pattern.permute.xlu0 %v280_v7 }
  0x15   :  { %75 = vperm.xlu1 %234, %v14_v0   ;;  %89 = vperm.xlu0 %235, %v14_v0  }
  0x19   :  { %78 = vperm.xlu1 %234, %v15_v3   ;;  %238 = vset.pattern.permute.xlu0 %v281_v8 }
  0x1a   :  { %106 = vperm.xlu0 %238, %v15_v3  }
  0x1d   :  { %236 = vset.pattern.permute.xlu1 %v280_v7 }
  0x1e   :  { %92 = vperm.xlu1 %236, %v15_v3   ;;  %240 = vset.pattern.permute.xlu0 %v282_v9 }
  0x22   :  { %237 = vset.pattern.permute.xlu1 %v281_v8 }
  0x23   :  { %103 = vperm.xlu1 %237, %v14_v0  }
  0x27   :  { %239 = vset.pattern.permute.xlu1 %v282_v9 }
  0x28   :  { %117 = vperm.xlu1 %239, %v14_v0   ;;  %v13_v0 = vld [vmem:[%s316_s1 + $0x8] sm:$0xff]  ;;  %s284_s1 = smov [#allocation2]  }
  0x29   :  { %s194_s16 = sshll.u32 %s284_s1, 4  ;;  %s195_s16 = int_to_ptr.vmem [resolvable:$true] %s194_s16 }
  0x2a   :  { %s253_s17 = scalar_lea.vmem %s195_s16, 128  ;;  %p258_p1 = scmp.lt.s32.totalorder %s195_s16, %s195_s16 }
  0x2b   :  { %p254_p0 = scmp.ne.s32.totalorder %s195_s16, %s253_s17  ;;  %p259_p2 = scmp.lt.s32.totalorder %s253_s17, %s253_s17 }
  0x2c   :  { %120 = vperm.xlu1 %239, %v15_v3  }
  0x2d   :  { %p260_p3 = por %p259_p2, %p258_p1 }
  0x2f   :  { %p261_p4 = pnand %p260_p3, %p254_p0 }
  0x7d   :  { %v34_v10 = vpop.permute.xlu1 %33  ;;  %v20_v12 = vpop.permute.xlu0 %19 }
  0x7e   :  { %vm38_vm0 = vcmp.eq.s32.totalorder %v17_v17, %v34_v10  ;;  %vm24_vm1 = vcmp.eq.s32.totalorder %v17_v17, %v20_v12 }
  0x7f   :  { %v204_v22 = vsel %vm38_vm0, 1.0, %v283_v21  ;;  %v202_v23 = vsel %vm24_vm1, 1.0, %v283_v21 }
  0x80   :  { %v44_v26 = vadd.f32 %v204_v22, %v202_v23 }
  0x81   :  { %v37_v11 = vpop.permute.xlu1 %36  ;;  %v23_v14 = vpop.permute.xlu0 %22 }
  0x82   :  { %vm39_vm3 = vcmp.eq.s32.totalorder %v17_v17, %v37_v11  ;;  %vm25_vm4 = vcmp.eq.s32.totalorder %v17_v17, %v23_v14 }
  0x83   :  { %v205_v27 = vsel %vm39_vm3, 1.0, %v283_v21  ;;  %v203_v28 = vsel %vm25_vm4, 1.0, %v283_v21 }
  0x84   :  { %v45_v35 = vadd.f32 %v205_v27, %v203_v28 }
  0x86   :  { %v51_v13 = vpop.permute.xlu1 %50  ;;  %v48_v18 = vpop.permute.xlu0 %47 }
  0x87   :  { %vm52_vm2 = vcmp.eq.s32.totalorder %v17_v17, %v48_v18  ;;  %vm53_vm6 = vcmp.eq.s32.totalorder %v17_v17, %v51_v13 }
  0x88   :  { %v206_v25 = vsel %vm52_vm2, 1.0, %v283_v21  ;;  %v207_v33 = vsel %vm53_vm6, 1.0, %v283_v21 }
  0x89   :  { %v58_v32 = vadd.f32 %v206_v25, %v44_v26  ;;  %v59_v38 = vadd.f32 %v207_v33, %v45_v35 }
  0x8b   :  { %v62_v16 = vpop.permute.xlu1 %61  ;;  %v65_v24 = vpop.permute.xlu0 %64 }
  0x8c   :  { %vm66_vm5 = vcmp.eq.s32.totalorder %v17_v17, %v62_v16  ;;  %vm67_vm8 = vcmp.eq.s32.totalorder %v17_v17, %v65_v24 }
  0x8d   :  { %v208_v29 = vsel %vm66_vm5, 1.0, %v283_v21  ;;  %v209_v37 = vsel %vm67_vm8, 1.0, %v283_v21 }
  0x8e   :  { %v72_v36 = vadd.f32 %v208_v29, %v58_v32  ;;  %v73_v44 = vadd.f32 %v209_v37, %v59_v38 }
  0x90   :  { %v76_v19 = vpop.permute.xlu1 %75  ;;  %v90_v30 = vpop.permute.xlu0 %89 }
  0x91   :  { %vm80_vm7 = vcmp.eq.s32.totalorder %v17_v17, %v76_v19  ;;  %vm94_vm9 = vcmp.eq.s32.totalorder %v17_v17, %v90_v30 }
  0x92   :  { %v210_v34 = vsel %vm80_vm7, 1.0, %v283_v21  ;;  %v212_v41 = vsel %vm94_vm9, 1.0, %v283_v21 }
  0x93   :  { %v86_v39 = vadd.f32 %v210_v34, %v72_v36 }
  0x94   :  { %v79_v20 = vpop.permute.xlu1 %78 }
  0x95   :  { %vm81_vm10 = vcmp.eq.s32.totalorder %v17_v17, %v79_v20  ;;  %v107_v43 = vpop.permute.xlu0 %106  ;;  %v100_v47 = vadd.f32 %v212_v41, %v86_v39 }
  0x96   :  { %v211_v42 = vsel %vm81_vm10, 1.0, %v283_v21  ;;  %vm109_vm13 = vcmp.eq.s32.totalorder %v17_v17, %v107_v43 }
  0x97   :  { %v87_v48 = vadd.f32 %v211_v42, %v73_v44  ;;  %v215_v52 = vsel %vm109_vm13, 1.0, %v283_v21 }
  0x99   :  { %v93_v31 = vpop.permute.xlu1 %92 }
  0x9a   :  { %vm95_vm11 = vcmp.eq.s32.totalorder %v17_v17, %v93_v31 }
  0x9b   :  { %v213_v45 = vsel %vm95_vm11, 1.0, %v283_v21 }
  0x9c   :  { %v101_v50 = vadd.f32 %v213_v45, %v87_v48 }
  0x9e   :  { %v104_v40 = vpop.permute.xlu1 %103  ;;  %v115_v56 = vadd.f32 %v215_v52, %v101_v50 }
  0x9f   :  { %vm108_vm12 = vcmp.eq.s32.totalorder %v17_v17, %v104_v40 }
  0xa0   :  { %v214_v46 = vsel %vm108_vm12, 1.0, %v283_v21 }
  0xa1   :  { %v114_v51 = vadd.f32 %v214_v46, %v100_v47 }
  0xa3   :  { %v118_v49 = vpop.permute.xlu1 %117 }
  0xa4   :  { %vm122_vm14 = vcmp.eq.s32.totalorder %v17_v17, %v118_v49 }
  0xa5   :  { %v216_v53 = vsel %vm122_vm14, 1.0, %v283_v21 }
  0xa6   :  { %v128_v54 = vadd.f32 %v216_v53, %v114_v51 }
  0xa7   :  { %v121_v55 = vpop.permute.xlu1 %120 }
  0xa8   :  { %v130_v57 = vmul.f32 2.0, %v128_v54  ;;  %vm123_vm15 = vcmp.eq.s32.totalorder %v17_v17, %v121_v55  ;;  %v178_v17 = vmul.f32 -0.5, %v128_v54 }
  0xa9   :  { %v217_v59 = vsel %vm123_vm15, 1.0, %v283_v21 }
  0xaa   :  { %v132_v60 = vsub.f32 1.0, %v130_v57  ;;  %v129_v61 = vadd.f32 %v217_v59, %v115_v56  ;;  %v180_v28 = vadd.f32 0.75, %v178_v17 }
  0xac   :  { %v134_v62 = vmul.f32 %v132_v60, %v12_v58  ;;  %v131_v63 = vmul.f32 2.0, %v129_v61  ;;  %v179_v25 = vmul.f32 -0.5, %v129_v61 }
  0xae   :  { %v136_v1 = vand.u32 2147483647, %v134_v62  ;;  %v133_v2 = vsub.f32 1.0, %v131_v63  ;;  %vm168_vm0 = vcmp.ge.f32.partialorder %v134_v62, 0.0  ;;  %v144_v35 = vmax.f32 %v134_v62, 0.0 }
  0xaf   :  { %v181_v38 = vadd.f32 0.75, %v179_v25 }
  0xb0   :  { %v138_v3 = vsub.f32 0.0, %v136_v1  ;;  %v135_v4 = vmul.f32 %v133_v2, %v13_v0 }
  0xb2   :  { %v140_v5 = vmul.f32 1.442695, %v138_v3  ;;  %v137_v6 = vand.u32 2147483647, %v135_v4  ;;  %vm169_vm2 = vcmp.ge.f32.partialorder %v135_v4, 0.0  ;;  %v145_v36 = vmax.f32 %v135_v4, 0.0 }
  0xb4   :  { %241 = vpow2.f32 %v140_v5  ;;  %v139_v7 = vsub.f32 0.0, %v137_v6 }
  0xb6   :  { %v142_v8 = vmul.f32 1.442695, %v139_v7 }
  0xb8   :  { %243 = vpow2.f32 %v142_v8 }
  0xc1   :  { %v242_v9 = vpop.eup %241 }
  0xc2   :  { %v146_v10 = vadd.f32 1.0, %v242_v9  ;;  %v149_v13 = vmul.f32 -0.5, %v242_v9  ;;  %v152_v18 = vand.u32 2147483647, %v242_v9  ;;  %v170_v22 = vsel %vm168_vm0, 1.0, %v242_v9 }
  0xc4   :  { %245 = vlog2.f32 %v146_v10  ;;  %v150_v15 = vadd.f32 1.0, %v149_v13  ;;  %vm153_vm1 = vcmp.lt.f32.partialorder %v152_v18, 0.0004427343 }
  0xc5   :  { %v244_v11 = vpop.eup %243  ;;  %247 = vrcp.f32 %v146_v10 }
  0xc6   :  { %v155_v12 = vadd.f32 1.0, %v244_v11  ;;  %v158_v14 = vmul.f32 -0.5, %v244_v11  ;;  %v161_v23 = vand.u32 2147483647, %v244_v11  ;;  %v151_v26 = vmul.f32 %v242_v9, %v150_v15 }
  0xc7   :  { %v171_v34 = vsel %vm169_vm2, 1.0, %v244_v11 }
  0xc8   :  { %249 = vlog2.f32 %v155_v12  ;;  %v159_v21 = vadd.f32 1.0, %v158_v14  ;;  %vm162_vm3 = vcmp.lt.f32.partialorder %v161_v23, 0.0004427343 }
  0xc9   :  { %251 = vrcp.f32 %v155_v12 }
  0xca   :  { %v160_v33 = vmul.f32 %v244_v11, %v159_v21 }
  0xd1   :  { %v246_v16 = vpop.eup %245 }
  0xd2   :  { %v248_v19 = vpop.eup %247  ;;  %v148_v20 = vmul.f32 0.6931472, %v246_v16 }
  0xd3   :  { %v173_v24 = vmul.f32 %v248_v19, %v170_v22 }
  0xd4   :  { %v154_v31 = vsel %vm153_vm1, %v151_v26, %v148_v20 }
  0xd5   :  { %v250_v27 = vpop.eup %249  ;;  %v176_v29 = vmul.f32 %v173_v24, %v173_v24  ;;  %v164_v40 = vadd.f32 %v154_v31, %v144_v35 }
  0xd6   :  { %v252_v30 = vpop.eup %251  ;;  %v157_v32 = vmul.f32 0.6931472, %v250_v27 }
  0xd7   :  { %v175_v37 = vmul.f32 %v252_v30, %v171_v34  ;;  %v182_v43 = vmul.f32 %v180_v28, %v176_v29 }
  0xd8   :  { %v163_v39 = vsel %vm162_vm3, %v160_v33, %v157_v32 }
  0xd9   :  { %v165_v41 = vadd.f32 %v163_v39, %v145_v36  ;;  %v177_v42 = vmul.f32 %v175_v37, %v175_v37  ;;  %v184_v45 = vmul.f32 %v182_v43, %v164_v40 }
  0xdb   :  { %v183_v44 = vmul.f32 %v181_v38, %v177_v42 }
  0xdd   :  { %v185_v46 = vmul.f32 %v183_v44, %v165_v41 }
  0xdf   :  { %v186_v47 = vadd.f32 %v185_v46, %v184_v45 }
  0xe1   :  { %187 = vst [vmem:[#allocation2] sm:$0xff] %v186_v47 }
  0xe2   :  { %264 = shalt.err (!%p261_p4)
}
  0xe3   :  { %197 = dma.vmem_to_hbm [thread:$0]  %s195_s16, 128, %s317_s2, [#allocation3]  }
  0xe4   :  { %273 = dma.done.wait [#allocation3], 128  }
  0xe5   :  { %274 = vsyncadd [#allocation3], 4294967168 }
  0xe6   :  { %201 = vsyncpa [#allocation3], 1 }

</bundles_post_ra>
